<compile_context>
chip_gen: v7x
topology: tpu7x:2x2x1
jax: 0.10.0
libtpu: 0.0.40
codegen_flags: <defaults>
</compile_context>

<pallas_src>
import jax
import jax.numpy as jnp
from jax.experimental import pallas as pl
from jax.experimental.pallas import tpu as pltpu

# Small TPU-friendly synthetic shapes consistent with the module
# (Cora would be N=2708, F=1433, C=7; scaled down here).
N = 128        # number of nodes
F_IN = 128     # node feature dim  (dataset.num_node_features)
HID = 16       # hidden dim of conv1 / linear / bn1
NCLS = 8       # number of classes (dataset.num_classes)
NPARAMS = 8    # packed-param lane width (b1 | gamma | beta | bl | b2pad | 0 ...)
K_HOPS = 10
ALPHA = 0.1
BN_EPS = 1e-5


def gprgnn_kernel(xT_ref, a_ref, w1T_ref, wlT_ref, w2T_ref, p_ref, o_ref):
    # All activations in transposed, lane-dense layout: [feat, N], f32.
    a = a_ref[...]                                  # f32 [N, N] (symmetric)

    # Packed per-feature parameters, one column each ([HID, 1] f32).
    b1 = p_ref[:, 0:1]
    gamma = p_ref[:, 1:2]
    beta = p_ref[:, 2:3]
    bl = p_ref[:, 3:4]
    b2 = p_ref[:NCLS, 4:5]                          # [NCLS, 1]

    # ---- GCNConv1 + ReLU:  h^T = relu( (W1^T X^T) A + b1 ) ------------------
    xw = jnp.dot(w1T_ref[...], xT_ref[...],
                 preferred_element_type=jnp.float32)          # [HID, N]
    h = jnp.dot(xw, a, preferred_element_type=jnp.float32)    # [HID, N]
    h = jnp.maximum(h + b1, 0.0)

    # ---- BatchNorm1d over the node axis (lanes), training-mode batch stats --
    # Folded affine: scale/shift are computed on the narrow [HID, 1] column,
    # then applied with a single wide multiply-add.
    inv_n = 1.0 / N
    mean = jnp.sum(h, axis=1, keepdims=True) * inv_n          # [HID, 1]
    ex2 = jnp.sum(h * h, axis=1, keepdims=True) * inv_n       # [HID, 1]
    var = ex2 - mean * mean                                   # biased variance
    scale = gamma * jax.lax.rsqrt(var + BN_EPS)               # [HID, 1]
    shift = beta - mean * scale                               # [HID, 1]
    h = h * scale + shift                                     # 2 wide VPU ops

    # ---- GPR-style fixed-point loop (matches the PyTorch forward: the loop
    #      only applies Linear+ReLU, no A_hat propagation).  ALPHA is folded
    #      into the (tiny) loop weights/bias once; relu(a*x) = a*relu(x), a>0.
    wl_s = wlT_ref[...] * ALPHA                     # [HID, HID], once
    bl_s = jnp.broadcast_to(bl * ALPHA, h.shape)    # hoisted broadcast [HID, N]
    one_m_alpha = 1.0 - ALPHA
    for _ in range(K_HOPS):                         # static unroll
        lin = jnp.dot(wl_s, h, preferred_element_type=jnp.float32) + bl_s
        h = jnp.maximum(lin, 0.0) + one_m_alpha * h

    # ---- GCNConv2:  out^T = (W2^T h^T) A + b2 --------------------------------
    hw = jnp.dot(w2T_ref[...], h,
                 preferred_element_type=jnp.float32)          # [NCLS, N]
    out = jnp.dot(hw, a, preferred_element_type=jnp.float32) + b2

    # ---- log_softmax over classes (sublane axis) -----------------------------
    m = jnp.max(out, axis=0, keepdims=True)
    z = out - m
    lse = jnp.log(jnp.sum(jnp.exp(z), axis=0, keepdims=True))
    o_ref[...] = z - lse                                      # [NCLS, N] f32


@jax.jit
def gprgnn_forward(x, a_hat, w1, b1, gamma, beta, wl, bl, w2, b2):
    # Layout plumbing (plain JAX, one-time): transposed f32 operands.
    xT = x.T.astype(jnp.float32)           # [F_IN, N]
    a = a_hat.astype(jnp.float32)          # [N, N]  (symmetric, no transpose)
    w1T = w1.T.astype(jnp.float32)         # [HID, F_IN]
    wlT = wl.T.astype(jnp.float32)         # [HID, HID]
    w2T = w2.T.astype(jnp.float32)         # [NCLS, HID]

    # Pack the five tiny row params into one [HID, NPARAMS] f32 input.
    b2p = jnp.zeros((HID,), jnp.float32).at[:NCLS].set(b2.reshape(-1))
    zcol = jnp.zeros((HID,), jnp.float32)
    params = jnp.stack(
        [b1.reshape(-1), gamma.reshape(-1), beta.reshape(-1),
         bl.reshape(-1), b2p, zcol, zcol, zcol], axis=1).astype(jnp.float32)

    full = lambda shape: pl.BlockSpec(shape, lambda i, s=shape: (0,) * len(s))
    outT = pl.pallas_call(
        gprgnn_kernel,
        out_shape=jax.ShapeDtypeStruct((NCLS, N), jnp.float32),
        grid=(1,),
        in_specs=[
            full((F_IN, N)),        # x^T
            full((N, N)),           # A_hat
            full((HID, F_IN)),      # W1^T
            full((HID, HID)),       # W_linear^T
            full((NCLS, HID)),      # W2^T
            full((HID, NPARAMS)),   # packed biases / BN params
        ],
        out_specs=full((NCLS, N)),
        compiler_params=pltpu.CompilerParams(
            dimension_semantics=("arbitrary",),
            vmem_limit_bytes=32 * 1024 * 1024),
    )(xT, a, w1T, wlT, w2T, params)
    return outT.T                                              # [N, NCLS]


def gprgnn_reference(x, a_hat, w1, b1, gamma, beta, wl, bl, w2, b2):
    """Pure-JAX f32 reference matching the PyTorch forward."""
    h = jnp.maximum(a_hat @ (x @ w1) + b1, 0.0)
    mean = jnp.mean(h, axis=0, keepdims=True)
    var = jnp.mean((h - mean) ** 2, axis=0, keepdims=True)
    h = gamma * (h - mean) / jnp.sqrt(var + BN_EPS) + beta
    for _ in range(K_HOPS):
        h = ALPHA * jnp.maximum(h @ wl + bl, 0.0) + (1 - ALPHA) * h
    out = a_hat @ (h @ w2) + b2
    return jax.nn.log_softmax(out, axis=1)


def build_normalized_adjacency(key, n):
    """Random undirected graph -> D^-1/2 (A + I) D^-1/2 as dense [n, n]."""
    upper = jax.random.bernoulli(key, p=0.05, shape=(n, n)).astype(jnp.float32)
    upper = jnp.triu(upper, k=1)
    adj = upper + upper.T                      # symmetric, no self loops yet
    adj = adj + jnp.eye(n, dtype=jnp.float32)  # add self loops (GCNConv default)
    deg = jnp.sum(adj, axis=1)
    d_inv_sqrt = jnp.where(deg > 0, 1.0 / jnp.sqrt(deg), 0.0)
    return adj * d_inv_sqrt[:, None] * d_inv_sqrt[None, :]


if __name__ == "__main__":
    key = jax.random.PRNGKey(0)
    kx, ka, k1, k2, k3, k4 = jax.random.split(key, 6)

    # Deterministic synthetic inputs / parameters.
    x = jax.random.normal(kx, (N, F_IN), dtype=jnp.float32)
    a_hat = build_normalized_adjacency(ka, N)

    def glorot(k, shape):
        fan_in, fan_out = shape
        scale = jnp.sqrt(6.0 / (fan_in + fan_out))
        return jax.random.uniform(k, shape, jnp.float32, -scale, scale)

    w1 = glorot(k1, (F_IN, HID))
    b1 = jnp.zeros((1, HID), jnp.float32)
    gamma = jnp.ones((1, HID), jnp.float32)
    beta = jnp.zeros((1, HID), jnp.float32)
    wl = glorot(k2, (HID, HID))
    bl = jax.random.uniform(k3, (1, HID), jnp.float32,
                            -1.0 / jnp.sqrt(HID), 1.0 / jnp.sqrt(HID))
    w2 = glorot(k4, (HID, NCLS))
    b2 = jnp.zeros((1, NCLS), jnp.float32)

    out = gprgnn_forward(x, a_hat, w1, b1, gamma, beta, wl, bl, w2, b2)
    out = jax.block_until_ready(out)

    # Sanity 1: log_softmax rows must exponentiate-and-sum to ~1.
    row_sums = jnp.sum(jnp.exp(out), axis=1)
    assert out.shape == (N, NCLS)
    assert bool(jnp.all(jnp.abs(row_sums - 1.0) < 1e-4))

    # Sanity 2: kernel vs f32 reference (f32 end-to-end -> tight tolerance).
    ref = gprgnn_reference(x, a_hat, w1, b1, gamma, beta, wl, bl, w2, b2)
    max_diff = float(jnp.max(jnp.abs(out - ref)))
    assert max_diff < 1e-2, f"kernel/reference mismatch: {max_diff}"

    print("KERNEL_OK")
</pallas_src>

<mosaic_0001>
module attributes {stable_mosaic.version = 11 : i64} {
  func.func @gprgnn_kernel(%arg0: i32, %arg1: memref<128x128xf32, #tpu.memory_space<vmem>>, %arg2: memref<128x128xf32, #tpu.memory_space<vmem>>, %arg3: memref<16x128xf32, #tpu.memory_space<vmem>>, %arg4: memref<16x16xf32, #tpu.memory_space<vmem>>, %arg5: memref<8x16xf32, #tpu.memory_space<vmem>>, %arg6: memref<16x8xf32, #tpu.memory_space<vmem>>, %arg7: memref<8x128xf32, #tpu.memory_space<vmem>>) attributes {dimension_semantics = [#tpu.dimension_semantics<arbitrary>], iteration_bounds = array<i64: 1>, scalar_prefetch = 0 : i64, scratch_operands = 0 : i64, tpu.core_type = #tpu.core_type<tc>, window_params = [{pipeline_mode = #tpu.pipeline_mode<synchronous>, transform_indices = @transform_0, window_bounds = array<i64: 128, 128>}, {pipeline_mode = #tpu.pipeline_mode<synchronous>, transform_indices = @transform_1, window_bounds = array<i64: 128, 128>}, {pipeline_mode = #tpu.pipeline_mode<synchronous>, transform_indices = @transform_2, window_bounds = array<i64: 16, 128>}, {pipeline_mode = #tpu.pipeline_mode<synchronous>, transform_indices = @transform_3, window_bounds = array<i64: 16, 16>}, {pipeline_mode = #tpu.pipeline_mode<synchronous>, transform_indices = @transform_4, window_bounds = array<i64: 8, 16>}, {pipeline_mode = #tpu.pipeline_mode<synchronous>, transform_indices = @transform_5, window_bounds = array<i64: 16, 8>}, {pipeline_mode = #tpu.pipeline_mode<synchronous>, transform_indices = @transform_6, window_bounds = array<i64: 8, 128>}]} {
    %c0 = arith.constant 0 : index
    %c0_0 = arith.constant 0 : index
    %0 = vector.load %arg2[%c0, %c0_0] : memref<128x128xf32, #tpu.memory_space<vmem>>, vector<128x128xf32>
    %c0_1 = arith.constant 0 : index
    %c0_2 = arith.constant 0 : index
    %1 = vector.load %arg6[%c0_1, %c0_2] : memref<16x8xf32, #tpu.memory_space<vmem>>, vector<16x1xf32>
    %c0_3 = arith.constant 0 : index
    %c1 = arith.constant 1 : index
    %2 = vector.load %arg6[%c0_3, %c1] : memref<16x8xf32, #tpu.memory_space<vmem>>, vector<16x1xf32>
    %c0_4 = arith.constant 0 : index
    %c2 = arith.constant 2 : index
    %3 = vector.load %arg6[%c0_4, %c2] : memref<16x8xf32, #tpu.memory_space<vmem>>, vector<16x1xf32>
    %c0_5 = arith.constant 0 : index
    %c3 = arith.constant 3 : index
    %4 = vector.load %arg6[%c0_5, %c3] : memref<16x8xf32, #tpu.memory_space<vmem>>, vector<16x1xf32>
    %c0_6 = arith.constant 0 : index
    %c4 = arith.constant 4 : index
    %5 = vector.load %arg6[%c0_6, %c4] : memref<16x8xf32, #tpu.memory_space<vmem>>, vector<8x1xf32>
    %c0_7 = arith.constant 0 : index
    %c0_8 = arith.constant 0 : index
    %6 = vector.load %arg3[%c0_7, %c0_8] : memref<16x128xf32, #tpu.memory_space<vmem>>, vector<16x128xf32>
    %c0_9 = arith.constant 0 : index
    %c0_10 = arith.constant 0 : index
    %7 = vector.load %arg1[%c0_9, %c0_10] : memref<128x128xf32, #tpu.memory_space<vmem>>, vector<128x128xf32>
    %cst = arith.constant dense<0.000000e+00> : vector<16x128xf32>
    %8 = tpu.matmul %6, %7, %cst {dimension_numbers = #tpu.dot_dimension_numbers<[1], [0], [0], [1], [0, 0, 1, 1], [], []>} : vector<16x128xf32>, vector<128x128xf32>, vector<16x128xf32> -> vector<16x128xf32>
    %cst_11 = arith.constant dense<0.000000e+00> : vector<16x128xf32>
    %9 = tpu.matmul %8, %0, %cst_11 {dimension_numbers = #tpu.dot_dimension_numbers<[1], [0], [0], [1], [0, 0, 1, 1], [], []>} : vector<16x128xf32>, vector<128x128xf32>, vector<16x128xf32> -> vector<16x128xf32>
    %10 = vector.broadcast %1 : vector<16x1xf32> to vector<16x128xf32>
    %11 = arith.addf %9, %10 : vector<16x128xf32>
    %cst_12 = arith.constant 0.000000e+00 : f32
    %12 = vector.broadcast %cst_12 : f32 to vector<16x128xf32>
    %13 = arith.maximumf %11, %12 : vector<16x128xf32>
    %cst_13 = arith.constant dense<0.000000e+00> : vector<16xf32>
    %14 = vector.multi_reduction <add>, %13, %cst_13 [1] : vector<16x128xf32> to vector<16xf32>
    %15 = vector.shape_cast %14 : vector<16xf32> to vector<16x1xf32>
    %cst_14 = arith.constant 7.812500e-03 : f32
    %16 = vector.broadcast %cst_14 : f32 to vector<16x1xf32>
    %17 = arith.mulf %15, %16 : vector<16x1xf32>
    %18 = arith.mulf %13, %13 : vector<16x128xf32>
    %cst_15 = arith.constant dense<0.000000e+00> : vector<16xf32>
    %19 = vector.multi_reduction <add>, %18, %cst_15 [1] : vector<16x128xf32> to vector<16xf32>
    %20 = vector.shape_cast %19 : vector<16xf32> to vector<16x1xf32>
    %cst_16 = arith.constant 7.812500e-03 : f32
    %21 = vector.broadcast %cst_16 : f32 to vector<16x1xf32>
    %22 = arith.mulf %20, %21 : vector<16x1xf32>
    %23 = arith.mulf %17, %17 : vector<16x1xf32>
    %24 = arith.subf %22, %23 : vector<16x1xf32>
    %cst_17 = arith.constant 9.99999974E-6 : f32
    %25 = vector.broadcast %cst_17 : f32 to vector<16x1xf32>
    %26 = arith.addf %24, %25 : vector<16x1xf32>
    %27 = math.rsqrt %26 : vector<16x1xf32>
    %28 = arith.mulf %2, %27 : vector<16x1xf32>
    %29 = arith.mulf %17, %28 : vector<16x1xf32>
    %30 = arith.subf %3, %29 : vector<16x1xf32>
    %31 = vector.broadcast %28 : vector<16x1xf32> to vector<16x128xf32>
    %32 = arith.mulf %13, %31 : vector<16x128xf32>
    %33 = vector.broadcast %30 : vector<16x1xf32> to vector<16x128xf32>
    %34 = arith.addf %32, %33 : vector<16x128xf32>
    %c0_18 = arith.constant 0 : index
    %c0_19 = arith.constant 0 : index
    %35 = vector.load %arg4[%c0_18, %c0_19] : memref<16x16xf32, #tpu.memory_space<vmem>>, vector<16x16xf32>
    %cst_20 = arith.constant 1.000000e-01 : f32
    %36 = vector.broadcast %cst_20 : f32 to vector<16x16xf32>
    %37 = arith.mulf %35, %36 : vector<16x16xf32>
    %cst_21 = arith.constant 1.000000e-01 : f32
    %38 = vector.broadcast %cst_21 : f32 to vector<16x1xf32>
    %39 = arith.mulf %4, %38 : vector<16x1xf32>
    %40 = vector.shape_cast %39 : vector<16x1xf32> to vector<16x1xf32>
    %41 = vector.broadcast %40 : vector<16x1xf32> to vector<16x128xf32>
    %cst_22 = arith.constant dense<0.000000e+00> : vector<16x128xf32>
    %42 = tpu.matmul %37, %34, %cst_22 {dimension_numbers = #tpu.dot_dimension_numbers<[1], [0], [0], [1], [0, 0, 1, 1], [], []>} : vector<16x16xf32>, vector<16x128xf32>, vector<16x128xf32> -> vector<16x128xf32>
    %43 = arith.addf %42, %41 : vector<16x128xf32>
    %cst_23 = arith.constant 0.000000e+00 : f32
    %44 = vector.broadcast %cst_23 : f32 to vector<16x128xf32>
    %45 = arith.maximumf %43, %44 : vector<16x128xf32>
    %cst_24 = arith.constant 0.899999976 : f32
    %46 = vector.broadcast %cst_24 : f32 to vector<16x128xf32>
    %47 = arith.mulf %46, %34 : vector<16x128xf32>
    %48 = arith.addf %45, %47 : vector<16x128xf32>
    %cst_25 = arith.constant dense<0.000000e+00> : vector<16x128xf32>
    %49 = tpu.matmul %37, %48, %cst_25 {dimension_numbers = #tpu.dot_dimension_numbers<[1], [0], [0], [1], [0, 0, 1, 1], [], []>} : vector<16x16xf32>, vector<16x128xf32>, vector<16x128xf32> -> vector<16x128xf32>
    %50 = arith.addf %49, %41 : vector<16x128xf32>
    %cst_26 = arith.constant 0.000000e+00 : f32
    %51 = vector.broadcast %cst_26 : f32 to vector<16x128xf32>
    %52 = arith.maximumf %50, %51 : vector<16x128xf32>
    %cst_27 = arith.constant 0.899999976 : f32
    %53 = vector.broadcast %cst_27 : f32 to vector<16x128xf32>
    %54 = arith.mulf %53, %48 : vector<16x128xf32>
    %55 = arith.addf %52, %54 : vector<16x128xf32>
    %cst_28 = arith.constant dense<0.000000e+00> : vector<16x128xf32>
    %56 = tpu.matmul %37, %55, %cst_28 {dimension_numbers = #tpu.dot_dimension_numbers<[1], [0], [0], [1], [0, 0, 1, 1], [], []>} : vector<16x16xf32>, vector<16x128xf32>, vector<16x128xf32> -> vector<16x128xf32>
    %57 = arith.addf %56, %41 : vector<16x128xf32>
    %cst_29 = arith.constant 0.000000e+00 : f32
    %58 = vector.broadcast %cst_29 : f32 to vector<16x128xf32>
    %59 = arith.maximumf %57, %58 : vector<16x128xf32>
    %cst_30 = arith.constant 0.899999976 : f32
    %60 = vector.broadcast %cst_30 : f32 to vector<16x128xf32>
    %61 = arith.mulf %60, %55 : vector<16x128xf32>
    %62 = arith.addf %59, %61 : vector<16x128xf32>
    %cst_31 = arith.constant dense<0.000000e+00> : vector<16x128xf32>
    %63 = tpu.matmul %37, %62, %cst_31 {dimension_numbers = #tpu.dot_dimension_numbers<[1], [0], [0], [1], [0, 0, 1, 1], [], []>} : vector<16x16xf32>, vector<16x128xf32>, vector<16x128xf32> -> vector<16x128xf32>
    %64 = arith.addf %63, %41 : vector<16x128xf32>
    %cst_32 = arith.constant 0.000000e+00 : f32
    %65 = vector.broadcast %cst_32 : f32 to vector<16x128xf32>
    %66 = arith.maximumf %64, %65 : vector<16x128xf32>
    %cst_33 = arith.constant 0.899999976 : f32
    %67 = vector.broadcast %cst_33 : f32 to vector<16x128xf32>
    %68 = arith.mulf %67, %62 : vector<16x128xf32>
    %69 = arith.addf %66, %68 : vector<16x128xf32>
    %cst_34 = arith.constant dense<0.000000e+00> : vector<16x128xf32>
    %70 = tpu.matmul %37, %69, %cst_34 {dimension_numbers = #tpu.dot_dimension_numbers<[1], [0], [0], [1], [0, 0, 1, 1], [], []>} : vector<16x16xf32>, vector<16x128xf32>, vector<16x128xf32> -> vector<16x128xf32>
    %71 = arith.addf %70, %41 : vector<16x128xf32>
    %cst_35 = arith.constant 0.000000e+00 : f32
    %72 = vector.broadcast %cst_35 : f32 to vector<16x128xf32>
    %73 = arith.maximumf %71, %72 : vector<16x128xf32>
    %cst_36 = arith.constant 0.899999976 : f32
    %74 = vector.broadcast %cst_36 : f32 to vector<16x128xf32>
    %75 = arith.mulf %74, %69 : vector<16x128xf32>
    %76 = arith.addf %73, %75 : vector<16x128xf32>
    %cst_37 = arith.constant dense<0.000000e+00> : vector<16x128xf32>
    %77 = tpu.matmul %37, %76, %cst_37 {dimension_numbers = #tpu.dot_dimension_numbers<[1], [0], [0], [1], [0, 0, 1, 1], [], []>} : vector<16x16xf32>, vector<16x128xf32>, vector<16x128xf32> -> vector<16x128xf32>
    %78 = arith.addf %77, %41 : vector<16x128xf32>
    %cst_38 = arith.constant 0.000000e+00 : f32
    %79 = vector.broadcast %cst_38 : f32 to vector<16x128xf32>
    %80 = arith.maximumf %78, %79 : vector<16x128xf32>
    %cst_39 = arith.constant 0.899999976 : f32
    %81 = vector.broadcast %cst_39 : f32 to vector<16x128xf32>
    %82 = arith.mulf %81, %76 : vector<16x128xf32>
    %83 = arith.addf %80, %82 : vector<16x128xf32>
    %cst_40 = arith.constant dense<0.000000e+00> : vector<16x128xf32>
    %84 = tpu.matmul %37, %83, %cst_40 {dimension_numbers = #tpu.dot_dimension_numbers<[1], [0], [0], [1], [0, 0, 1, 1], [], []>} : vector<16x16xf32>, vector<16x128xf32>, vector<16x128xf32> -> vector<16x128xf32>
    %85 = arith.addf %84, %41 : vector<16x128xf32>
    %cst_41 = arith.constant 0.000000e+00 : f32
    %86 = vector.broadcast %cst_41 : f32 to vector<16x128xf32>
    %87 = arith.maximumf %85, %86 : vector<16x128xf32>
    %cst_42 = arith.constant 0.899999976 : f32
    %88 = vector.broadcast %cst_42 : f32 to vector<16x128xf32>
    %89 = arith.mulf %88, %83 : vector<16x128xf32>
    %90 = arith.addf %87, %89 : vector<16x128xf32>
    %cst_43 = arith.constant dense<0.000000e+00> : vector<16x128xf32>
    %91 = tpu.matmul %37, %90, %cst_43 {dimension_numbers = #tpu.dot_dimension_numbers<[1], [0], [0], [1], [0, 0, 1, 1], [], []>} : vector<16x16xf32>, vector<16x128xf32>, vector<16x128xf32> -> vector<16x128xf32>
    %92 = arith.addf %91, %41 : vector<16x128xf32>
    %cst_44 = arith.constant 0.000000e+00 : f32
    %93 = vector.broadcast %cst_44 : f32 to vector<16x128xf32>
    %94 = arith.maximumf %92, %93 : vector<16x128xf32>
    %cst_45 = arith.constant 0.899999976 : f32
    %95 = vector.broadcast %cst_45 : f32 to vector<16x128xf32>
    %96 = arith.mulf %95, %90 : vector<16x128xf32>
    %97 = arith.addf %94, %96 : vector<16x128xf32>
    %cst_46 = arith.constant dense<0.000000e+00> : vector<16x128xf32>
    %98 = tpu.matmul %37, %97, %cst_46 {dimension_numbers = #tpu.dot_dimension_numbers<[1], [0], [0], [1], [0, 0, 1, 1], [], []>} : vector<16x16xf32>, vector<16x128xf32>, vector<16x128xf32> -> vector<16x128xf32>
    %99 = arith.addf %98, %41 : vector<16x128xf32>
    %cst_47 = arith.constant 0.000000e+00 : f32
    %100 = vector.broadcast %cst_47 : f32 to vector<16x128xf32>
    %101 = arith.maximumf %99, %100 : vector<16x128xf32>
    %cst_48 = arith.constant 0.899999976 : f32
    %102 = vector.broadcast %cst_48 : f32 to vector<16x128xf32>
    %103 = arith.mulf %102, %97 : vector<16x128xf32>
    %104 = arith.addf %101, %103 : vector<16x128xf32>
    %cst_49 = arith.constant dense<0.000000e+00> : vector<16x128xf32>
    %105 = tpu.matmul %37, %104, %cst_49 {dimension_numbers = #tpu.dot_dimension_numbers<[1], [0], [0], [1], [0, 0, 1, 1], [], []>} : vector<16x16xf32>, vector<16x128xf32>, vector<16x128xf32> -> vector<16x128xf32>
    %106 = arith.addf %105, %41 : vector<16x128xf32>
    %cst_50 = arith.constant 0.000000e+00 : f32
    %107 = vector.broadcast %cst_50 : f32 to vector<16x128xf32>
    %108 = arith.maximumf %106, %107 : vector<16x128xf32>
    %cst_51 = arith.constant 0.899999976 : f32
    %109 = vector.broadcast %cst_51 : f32 to vector<16x128xf32>
    %110 = arith.mulf %109, %104 : vector<16x128xf32>
    %111 = arith.addf %108, %110 : vector<16x128xf32>
    %c0_52 = arith.constant 0 : index
    %c0_53 = arith.constant 0 : index
    %112 = vector.load %arg5[%c0_52, %c0_53] : memref<8x16xf32, #tpu.memory_space<vmem>>, vector<8x16xf32>
    %cst_54 = arith.constant dense<0.000000e+00> : vector<8x128xf32>
    %113 = tpu.matmul %112, %111, %cst_54 {dimension_numbers = #tpu.dot_dimension_numbers<[1], [0], [0], [1], [0, 0, 1, 1], [], []>} : vector<8x16xf32>, vector<16x128xf32>, vector<8x128xf32> -> vector<8x128xf32>
    %cst_55 = arith.constant dense<0.000000e+00> : vector<8x128xf32>
    %114 = tpu.matmul %113, %0, %cst_55 {dimension_numbers = #tpu.dot_dimension_numbers<[1], [0], [0], [1], [0, 0, 1, 1], [], []>} : vector<8x128xf32>, vector<128x128xf32>, vector<8x128xf32> -> vector<8x128xf32>
    %115 = vector.broadcast %5 : vector<8x1xf32> to vector<8x128xf32>
    %116 = arith.addf %114, %115 : vector<8x128xf32>
    %cst_56 = arith.constant dense<0xFF800000> : vector<128xf32>
    %117 = vector.multi_reduction <maximumf>, %116, %cst_56 [0] : vector<8x128xf32> to vector<128xf32>
    %118 = vector.shape_cast %117 : vector<128xf32> to vector<1x128xf32>
    %119 = vector.broadcast %118 : vector<1x128xf32> to vector<8x128xf32>
    %120 = arith.subf %116, %119 : vector<8x128xf32>
    %121 = math.exp %120 : vector<8x128xf32>
    %cst_57 = arith.constant dense<0.000000e+00> : vector<128xf32>
    %122 = vector.multi_reduction <add>, %121, %cst_57 [0] : vector<8x128xf32> to vector<128xf32>
    %123 = vector.shape_cast %122 : vector<128xf32> to vector<1x128xf32>
    %124 = math.log %123 : vector<1x128xf32>
    %125 = vector.broadcast %124 : vector<1x128xf32> to vector<8x128xf32>
    %126 = arith.subf %120, %125 : vector<8x128xf32>
    %c0_58 = arith.constant 0 : index
    %c0_59 = arith.constant 0 : index
    %127 = vector.load %arg7[%c0_58, %c0_59] : memref<8x128xf32, #tpu.memory_space<vmem>>, vector<8x128xf32>
    tpu.vector_store %arg7[%c0_58, %c0_59], %126 {strides = array<i32>} : memref<8x128xf32, #tpu.memory_space<vmem>>, vector<8x128xf32>,
    return
  }
  func.func @transform_0(%arg0: i32) -> (i32, i32) {
    %c0_i32 = arith.constant 0 : i32
    %c0_i32_0 = arith.constant 0 : i32
    %c0_i32_1 = arith.constant 0 : i32
    return %c0_i32, %c0_i32_0 : i32, i32
  }
  func.func @transform_1(%arg0: i32) -> (i32, i32) {
    %c0_i32 = arith.constant 0 : i32
    %c0_i32_0 = arith.constant 0 : i32
    %c0_i32_1 = arith.constant 0 : i32
    return %c0_i32, %c0_i32_0 : i32, i32
  }
  func.func @transform_2(%arg0: i32) -> (i32, i32) {
    %c0_i32 = arith.constant 0 : i32
    %c0_i32_0 = arith.constant 0 : i32
    %c0_i32_1 = arith.constant 0 : i32
    return %c0_i32, %c0_i32_0 : i32, i32
  }
  func.func @transform_3(%arg0: i32) -> (i32, i32) {
    %c0_i32 = arith.constant 0 : i32
    %c0_i32_0 = arith.constant 0 : i32
    %c0_i32_1 = arith.constant 0 : i32
    return %c0_i32, %c0_i32_0 : i32, i32
  }
  func.func @transform_4(%arg0: i32) -> (i32, i32) {
    %c0_i32 = arith.constant 0 : i32
    %c0_i32_0 = arith.constant 0 : i32
    %c0_i32_1 = arith.constant 0 : i32
    return %c0_i32, %c0_i32_0 : i32, i32
  }
  func.func @transform_5(%arg0: i32) -> (i32, i32) {
    %c0_i32 = arith.constant 0 : i32
    %c0_i32_0 = arith.constant 0 : i32
    %c0_i32_1 = arith.constant 0 : i32
    return %c0_i32, %c0_i32_0 : i32, i32
  }
  func.func @transform_6(%arg0: i32) -> (i32, i32) {
    %c0_i32 = arith.constant 0 : i32
    %c0_i32_0 = arith.constant 0 : i32
    %c0_i32_1 = arith.constant 0 : i32
    return %c0_i32, %c0_i32_0 : i32, i32
  }
}

</mosaic_0001>

<bundles_post_ra>
// kernel: gprgnn_forward.1
= control target key start
LH: loop header
LB: loop body
LE: loop exit
PB: predicated region body
PF: predicated region fallthrough
CT: control target
= control target key end

     0   :  { %s2071_s0 = inlined_call_operand.vmem [shape: f32[128,128], index: 0, kind: input, shape index: {}]   ;;  %s2072_s1 = inlined_call_operand.vmem [shape: f32[128,128], index: 1, kind: input, shape index: {}]   ;;  %s2073_s2 = inlined_call_operand.vmem [shape: f32[16,128], index: 2, kind: input, shape index: {}]   ;;  %s2074_s3 = inlined_call_operand.vmem [shape: f32[16,16], index: 3, kind: input, shape index: {}]   ;;  %s2075_s4 = inlined_call_operand.vmem [shape: f32[8,16], index: 4, kind: input, shape index: {}]   ;;  %s2076_s5 = inlined_call_operand.vmem [shape: f32[16,8], index: 5, kind: input, shape index: {}]   ;;  %s2077_s6 = inlined_call_operand.hbm [shape: f32[8,128], index: 6, kind: output, shape index: {}]  }
   0x1   :  { %v44_v0 = vld [vmem:[%s2071_s0] sm:$0xff]  ;;  %v45_v1 = vld [vmem:[%s2071_s0 + $0x8] sm:$0xff]  ;;  %v46_v2 = vld [vmem:[%s2071_s0 + $0x10] sm:$0xff] }
   0x2   :  { %v1595_v3 = vpack.c.bf16 %v45_v1, %v44_v0  ;;  %v47_v4 = vld [vmem:[%s2071_s0 + $0x18] sm:$0xff]  ;;  %v48_v6 = vld [vmem:[%s2071_s0 + $0x20] sm:$0xff]  ;;  %v49_v7 = vld [vmem:[%s2071_s0 + $0x28] sm:$0xff] }
   0x3   :  { %v1599_v5 = vpack.c.bf16 %v47_v4, %v46_v2  ;;  %v1603_v8 = vpack.c.bf16 %v49_v7, %v48_v6  ;;  %v50_v9 = vld [vmem:[%s2071_s0 + $0x30] sm:$0xff]  ;;  %v51_v10 = vld [vmem:[%s2071_s0 + $0x38] sm:$0xff]  ;;  %v42_v11 = vld [vmem:[%s2073_s2] sm:$0xff] }
   0x4   :  { %1596 = vmatprep.subr.bf16.mxu0 %v1595_v3  ;;  %1445 = vmatprep.mubr.f32.mxu0 %v42_v11  ;;  %v24_v12 = vld [vmem:[%s2072_s1] sm:$0xff]  ;;  %v25_v13 = vld [vmem:[%s2072_s1 + $0x8] sm:$0xff]  ;;  %v26_v14 = vld [vmem:[%s2072_s1 + $0x10] sm:$0xff]  ;;  %v1607_v20 = vpack.c.bf16 %v51_v10, %v50_v9 }
   0x5   :  { %1598 = vmatpush3.bf16.msra.mxu0 %v1595_v3  ;;  %v1856_v15 = vpack.c.bf16 %v25_v13, %v24_v12  ;;  %v27_v16 = vld [vmem:[%s2072_s1 + $0x18] sm:$0xff]  ;;  %v28_v18 = vld [vmem:[%s2072_s1 + $0x20] sm:$0xff]  ;;  %v29_v19 = vld [vmem:[%s2072_s1 + $0x28] sm:$0xff] }
   0x6   :  { %1600 = vmatprep.subr.bf16.mxu0 %v1599_v5  ;;  %v1861_v17 = vpack.c.bf16 %v27_v16, %v26_v14  ;;  %v52_v21 = vld [vmem:[%s2071_s0 + $0x40] sm:$0xff]  ;;  %v53_v22 = vld [vmem:[%s2071_s0 + $0x48] sm:$0xff]  ;;  %v1878_v23 = vpack.c.bf16 %v29_v19, %v28_v18 }
   0x7   :  { %1628 = vmatprep.subr.bf16.mxu1 %v1856_v15 }
   0x8   :  { %1630 = vmatpush3.bf16.msra.mxu1 %v1856_v15 }
   0x9   :  { %1602 = vmatpush3.bf16.msra.mxu0 %v1599_v5  ;;  %1632 = vmatprep.subr.bf16.mxu1 %v1861_v17 }
   0xa   :  { %1604 = vmatprep.subr.bf16.mxu0 %v1603_v8 }
   0xb   :  { %11 = vsyncpa [#allocation3], 0  ;;  %v30_v24 = vld [vmem:[%s2072_s1 + $0x30] sm:$0xff]  ;;  %v31_v25 = vld [vmem:[%s2072_s1 + $0x38] sm:$0xff]  ;;  %v1611_v26 = vpack.c.bf16 %v53_v22, %v52_v21  ;;  %v1775_v51 = vmov 0   ;;  %v1776_v1 = vmov 1  }
   0xc   :  { %v54_v27 = vld [vmem:[%s2071_s0 + $0x50] sm:$0xff]  ;;  %v55_v28 = vld [vmem:[%s2071_s0 + $0x58] sm:$0xff]  ;;  %1634 = vmatpush3.bf16.msra.mxu1 %v1861_v17  ;;  %v1894_v29 = vpack.c.bf16 %v31_v25, %v30_v24  ;;  %v32_v30 = vld [vmem:[%s2072_s1 + $0x40] sm:$0xff]  ;;  %1736 = vset.pattern.permute.xlu0 %v1775_v51  ;;  %v1777_v18 = vmov 2   ;;  %vm298_vm0 = vcmask 130048   ;;  %vm1781_vm1 = vmmov 0  }
   0xd   :  { %1606 = vmatpush3.bf16.msra.mxu0 %v1603_v8  ;;  %1636 = vmatprep.subr.bf16.mxu1 %v1878_v23  ;;  %v33_v31 = vld [vmem:[%s2072_s1 + $0x48] sm:$0xff]  ;;  %v1615_v32 = vpack.c.bf16 %v55_v28, %v54_v27  ;;  %v56_v33 = vld [vmem:[%s2071_s0 + $0x60] sm:$0xff]  ;;  %v34_v36 = vld [vmem:[%s2072_s1 + $0x50] sm:$0xff] }
   0xe   :  { %1608 = vmatprep.subr.bf16.mxu0 %v1607_v20  ;;  %v57_v34 = vld [vmem:[%s2071_s0 + $0x68] sm:$0xff]  ;;  %v1910_v35 = vpack.c.bf16 %v33_v31, %v32_v30  ;;  %v35_v37 = vld [vmem:[%s2072_s1 + $0x58] sm:$0xff]  ;;  %v58_v39 = vld [vmem:[%s2071_s0 + $0x70] sm:$0xff]  ;;  %1737 = vset.pattern.permute.xlu1 %v1776_v1 }
   0xf   :  { %v1619_v38 = vpack.c.bf16 %v57_v34, %v56_v33  ;;  %v59_v40 = vld [vmem:[%s2071_s0 + $0x78] sm:$0xff]  ;;  %v1926_v41 = vpack.c.bf16 %v35_v37, %v34_v36  ;;  %v36_v42 = vld [vmem:[%s2072_s1 + $0x60] sm:$0xff]  ;;  %v37_v43 = vld [vmem:[%s2072_s1 + $0x68] sm:$0xff]  ;;  %v1779_v34 = vmov 3  }
  0x10   :  { %1638 = vmatpush3.bf16.msra.mxu1 %v1878_v23  ;;  %v1623_v44 = vpack.c.bf16 %v59_v40, %v58_v39  ;;  %v1936_v45 = vpack.c.bf16 %v37_v43, %v36_v42  ;;  %v38_v46 = vld [vmem:[%s2072_s1 + $0x70] sm:$0xff]  ;;  %v39_v47 = vld [vmem:[%s2072_s1 + $0x78] sm:$0xff]  ;;  %v43_v49 = vld [vmem:[%s2073_s2 + $0x8] sm:$0xff]  ;;  %s1778_s2 = smov 1  }
  0x11   :  { %1610 = vmatpush3.bf16.msra.mxu0 %v1607_v20  ;;  %1640 = vmatprep.subr.bf16.mxu1 %v1894_v29  ;;  %v1946_v48 = vpack.c.bf16 %v39_v47, %v38_v46  ;;  %v1957_v50 = vld [vmem:[%s2076_s5] sm:$0xff]  ;;  %v1963_v52 = vld [vmem:[%s2076_s5 + $0x8] sm:$0xff] }
  0x12   :  { %1612 = vmatprep.subr.bf16.mxu0 %v1611_v26  ;;  %137 = vperm.xlu0 %1736, %v1957_v50   ;;  %v282_v31 = vld [vmem:[%s2074_s3] sm:$0xff]  ;;  %v286_v33 = vmul.f32 0.1, %v1957_v50  ;;  %v287_v36 = vmul.f32 0.1, %v1963_v52  ;;  %v283_v47 = vld [vmem:[%s2074_s3 + $0x8] sm:$0xff] }
  0x13   :  { %v1984_v51 = vmul.f32 0.1, %v283_v47 }
  0x14   :  { %1642 = vmatpush3.bf16.msra.mxu1 %v1894_v29 }
  0x15   :  { %1614 = vmatpush3.bf16.msra.mxu0 %v1611_v26  ;;  %1644 = vmatprep.subr.bf16.mxu1 %v1910_v35 }
  0x16   :  { %1616 = vmatprep.subr.bf16.mxu0 %v1615_v32  ;;  %142 = vperm.xlu0 %1736, %v1963_v52  }
  0x18   :  { %1646 = vmatpush3.bf16.msra.mxu1 %v1910_v35 }
  0x19   :  { %1618 = vmatpush3.bf16.msra.mxu0 %v1615_v32  ;;  %1648 = vmatprep.subr.bf16.mxu1 %v1926_v41  ;;  %v1973_v32 = vmul.f32 0.1, %v282_v31 }
  0x1a   :  { %1620 = vmatprep.subr.bf16.mxu0 %v1619_v38  ;;  %1738 = vset.pattern.permute.xlu0 %v1777_v18 }
  0x1c   :  { %1650 = vmatpush3.bf16.msra.mxu1 %v1926_v41 }
  0x1d   :  { %1622 = vmatpush3.bf16.msra.mxu0 %v1619_v38  ;;  %1652 = vmatprep.subr.bf16.mxu1 %v1936_v45 }
  0x1e   :  { %1624 = vmatprep.subr.bf16.mxu0 %v1623_v44 }
  0x20   :  { %1654 = vmatpush3.bf16.msra.mxu1 %v1936_v45 }
  0x21   :  { %1626 = vmatpush3.bf16.msra.mxu0 %v1623_v44  ;;  %1656 = vmatprep.subr.bf16.mxu1 %v1946_v48 }
  0x24   :  { %1446 = vmatmul.mubr.f32.vlgmr.msra.gmra.mrb[0].mxu0 %v43_v49  ;;  %1658 = vmatpush3.bf16.msra.mxu1 %v1946_v48 }
  0x25   :  { %1487 = vmatprep.mubr.msk.f32.mxu0 %vm298_vm0, %v1973_v32 }
  0x91   :  { %v138_v55 = vpop.permute.xlu0 %137 }
  0x95   :  { %v143_v56 = vpop.permute.xlu0 %142 }
  0xf7   :  { %v1447_v53 = vpop.f32.mrb[0].mxu0 }
  0xf8   :  { %v126_v54 = vpop.f32.mrb[1].mxu0 }
  0xf9   :  { %1480 = vmatprep.mubr.f32.mxu1 %v126_v54 }
  0xfa   :  { %1481 = vmatmul.mubr.f32.vlgmr.msra.gmra.mrb[0].mxu1 %v1447_v53 }
  0xfb   :  { %1536 = vmatprep.mubr.msk.f32.mxu1 %vm298_vm0, %v1973_v32 }
 0x1cd   :  { %v1482_v57 = vpop.f32.mrb[0].mxu1 }
 0x1ce   :  { %v217_v58 = vadd.f32 %v1482_v57, %v143_v56  ;;  %v211_v59 = vpop.f32.mrb[1].mxu1 }
 0x1cf   :  { %v212_v60 = vadd.f32 %v211_v59, %v138_v55 }
 0x1d0   :  { %v221_v61 = vmax.f32 %v217_v58, 0.0 }
 0x1d1   :  { %v220_v62 = vmax.f32 %v212_v60, 0.0 }
 0x1d2   :  { %224 = vadd.xlane.f32.xlu1 %v221_v61  ;;  %v229_v0 = vmul.f32 %v221_v61, %v221_v61 }
 0x1d3   :  { %v228_v63 = vmul.f32 %v220_v62, %v220_v62 }
 0x1d5   :  { %230 = vadd.xlane.f32.xlu0 %v228_v63 }
 0x1d6   :  { %222 = vadd.xlane.f32.xlu1 %v220_v62 }
 0x1da   :  { %232 = vadd.xlane.f32.xlu1 %v229_v0 }
 0x25f   :  { %v225_v2 = vpop.xlane.xlu1 %224 }
 0x260   :  { %v227_v5 = vmul.f32 0.0078125, %v225_v2 }
 0x262   :  { %v231_v3 = vpop.xlane.xlu0 %230  ;;  %v237_v10 = vmul.f32 %v227_v5, %v227_v5 }
 0x263   :  { %v223_v4 = vpop.xlane.xlu1 %222  ;;  %v234_v7 = vmul.f32 0.0078125, %v231_v3 }
 0x264   :  { %v226_v6 = vmul.f32 0.0078125, %v223_v4 }
 0x266   :  { %v236_v8 = vmul.f32 %v226_v6, %v226_v6 }
 0x267   :  { %v233_v9 = vpop.xlane.xlu1 %232 }
 0x268   :  { %v238_v11 = vsub.f32 %v234_v7, %v236_v8  ;;  %v235_v12 = vmul.f32 0.0078125, %v233_v9 }
 0x26a   :  { %v240_v13 = vadd.f32 1e-05, %v238_v11  ;;  %v239_v14 = vsub.f32 %v235_v12, %v237_v10 }
 0x26c   :  { %1743 = vrsqrt.f32 %v240_v13  ;;  %v241_v16 = vadd.f32 1e-05, %v239_v14 }
 0x26e   :  { %1745 = vrsqrt.f32 %v241_v16 }
 0x276   :  { %v1744_v19 = vpop.eup %1743 }
 0x277   :  { %v244_v20 = vmul.f32 %v1744_v19, %v1957_v50 }
 0x278   :  { %v1746_v21 = vpop.eup %1745 }
 0x279   :  { %v246_v22 = vmul.f32 %v244_v20, %v226_v6  ;;  %v245_v24 = vmul.f32 %v1746_v21, %v1963_v52 }
 0x27b   :  { %250 = vrot.lane.b32.xlu1 %v246_v22, %s1778_s2  ;;  %v247_v25 = vmul.f32 %v245_v24, %v227_v5 }
 0x27f   :  { %252 = vrot.lane.b32.xlu1 %v247_v25, %s1778_s2 }
 0x283   :  { %260 = vperm.xlu1 %1737, %v244_v20  }
 0x287   :  { %265 = vperm.xlu1 %1737, %v245_v24  }
 0x28b   :  { %1739 = vset.pattern.permute.xlu1 %v1777_v18 }
 0x2ed   :  { %v251_v26 = vpop.permute.xlu1 %250 }
 0x2ee   :  { %v256_v27 = vsub.f32 %v1957_v50, %v251_v26 }
 0x2f0   :  { %272 = vperm.xlu0 %1738, %v256_v27  }
 0x2f1   :  { %v253_v28 = vpop.permute.xlu1 %252 }
 0x2f2   :  { %v257_v30 = vsub.f32 %v1963_v52, %v253_v28 }
 0x2f4   :  { %277 = vperm.xlu1 %1739, %v257_v30  }
 0x2f8   :  { %1740 = vset.pattern.permute.xlu1 %v1779_v34 }
 0x2f9   :  { %290 = vperm.xlu1 %1740, %v286_v33  }
 0x2fd   :  { %295 = vperm.xlu1 %1740, %v287_v36  }
 0x302   :  { %v261_v37 = vpop.permute.xlu1 %260 }
 0x303   :  { %v268_v40 = vmul.f32 %v261_v37, %v220_v62 }
 0x306   :  { %v266_v38 = vpop.permute.xlu1 %265 }
 0x307   :  { %v269_v42 = vmul.f32 %v266_v38, %v221_v61 }
 0x36f   :  { %v273_v39 = vpop.permute.xlu0 %272 }
 0x370   :  { %v280_v44 = vadd.f32 %v273_v39, %v268_v40 }
 0x372   :  { %v382_v60 = vmul.f32 0.9, %v280_v44 }
 0x373   :  { %v278_v43 = vpop.permute.xlu1 %277 }
 0x374   :  { %v281_v46 = vadd.f32 %v278_v43, %v269_v42 }
 0x376   :  { %v1659_v49 = vpack.c.bf16 %v281_v46, %v280_v44  ;;  %v383_v58 = vmul.f32 0.9, %v281_v46 }
 0x378   :  { %1660 = vmatprep.subr.bf16.mxu0 %v1659_v49  ;;  %v1990_v52 = vpop.permute.xlu1 %290 }
 0x379   :  { %1662 = vmatpush3.bf16.msra.mxu0 %v1659_v49 }
 0x37c   :  { %1488 = vmatmul.mubr.msk.f32.vlgmr.msra.gmra.mrb[2].mxu0 %vm298_vm0, %v1984_v51  ;;  %v1992_v53 = vpop.permute.xlu1 %295 }
 0x37d   :  { %1494 = vmatprep.mubr.msk.f32.mxu0 %vm298_vm0, %v1973_v32 }
 0x44f   :  { %v1489_v54 = vpop.f32.mrb[2].mxu0 }
 0x450   :  { %v377_v55 = vadd.f32 %v1489_v54, %v1992_v53  ;;  %v371_v56 = vpop.f32.mrb[3].mxu0 }
 0x451   :  { %v372_v57 = vadd.f32 %v371_v56, %v1990_v52 }
 0x452   :  { %v381_v59 = vmax.f32 %v377_v55, 0.0 }
 0x453   :  { %v380_v61 = vmax.f32 %v372_v57, 0.0 }
 0x454   :  { %v385_v62 = vadd.f32 %v383_v58, %v381_v59 }
 0x455   :  { %v384_v63 = vadd.f32 %v382_v60, %v380_v61 }
 0x456   :  { %v464_v6 = vmul.f32 0.9, %v385_v62 }
 0x457   :  { %v1663_v0 = vpack.c.bf16 %v385_v62, %v384_v63  ;;  %v463_v8 = vmul.f32 0.9, %v384_v63 }
 0x459   :  { %1664 = vmatprep.subr.bf16.mxu0 %v1663_v0 }
 0x45a   :  { %1666 = vmatpush3.bf16.msra.mxu0 %v1663_v0 }
 0x45d   :  { %1495 = vmatmul.mubr.msk.f32.vlgmr.msra.gmra.mrb[4].mxu0 %vm298_vm0, %v1984_v51 }
 0x45e   :  { %1501 = vmatprep.mubr.msk.f32.mxu0 %vm298_vm0, %v1973_v32 }
 0x530   :  { %v1496_v1 = vpop.f32.mrb[4].mxu0 }
 0x531   :  { %v458_v2 = vadd.f32 %v1496_v1, %v1992_v53  ;;  %v452_v3 = vpop.f32.mrb[5].mxu0 }
 0x532   :  { %v453_v4 = vadd.f32 %v452_v3, %v1990_v52 }
 0x533   :  { %v462_v5 = vmax.f32 %v458_v2, 0.0 }
 0x534   :  { %v461_v7 = vmax.f32 %v453_v4, 0.0 }
 0x535   :  { %v466_v9 = vadd.f32 %v464_v6, %v462_v5 }
 0x536   :  { %v465_v10 = vadd.f32 %v463_v8, %v461_v7 }
 0x537   :  { %v545_v19 = vmul.f32 0.9, %v466_v9 }
 0x538   :  { %v1667_v11 = vpack.c.bf16 %v466_v9, %v465_v10  ;;  %v544_v21 = vmul.f32 0.9, %v465_v10 }
 0x53a   :  { %1668 = vmatprep.subr.bf16.mxu0 %v1667_v11 }
 0x53b   :  { %1670 = vmatpush3.bf16.msra.mxu0 %v1667_v11 }
 0x53e   :  { %1502 = vmatmul.mubr.msk.f32.vlgmr.msra.gmra.mrb[6].mxu0 %vm298_vm0, %v1984_v51 }
 0x53f   :  { %1508 = vmatprep.mubr.msk.f32.mxu0 %vm298_vm0, %v1973_v32 }
 0x611   :  { %v1503_v12 = vpop.f32.mrb[6].mxu0 }
 0x612   :  { %v539_v13 = vadd.f32 %v1503_v12, %v1992_v53  ;;  %v533_v14 = vpop.f32.mrb[7].mxu0 }
 0x613   :  { %v534_v16 = vadd.f32 %v533_v14, %v1990_v52 }
 0x614   :  { %v543_v18 = vmax.f32 %v539_v13, 0.0 }
 0x615   :  { %v542_v20 = vmax.f32 %v534_v16, 0.0 }
 0x616   :  { %v547_v22 = vadd.f32 %v545_v19, %v543_v18 }
 0x617   :  { %v546_v24 = vadd.f32 %v544_v21, %v542_v20 }
 0x618   :  { %v626_v33 = vmul.f32 0.9, %v547_v22 }
 0x619   :  { %v1671_v25 = vpack.c.bf16 %v547_v22, %v546_v24  ;;  %v625_v36 = vmul.f32 0.9, %v546_v24 }
 0x61b   :  { %1672 = vmatprep.subr.bf16.mxu0 %v1671_v25 }
 0x61c   :  { %1674 = vmatpush3.bf16.msra.mxu0 %v1671_v25 }
 0x61f   :  { %1509 = vmatmul.mubr.msk.f32.vlgmr.msra.gmra.mrb[8].mxu0 %vm298_vm0, %v1984_v51 }
 0x620   :  { %1515 = vmatprep.mubr.msk.f32.mxu0 %vm298_vm0, %v1973_v32 }
 0x6f2   :  { %v1510_v26 = vpop.f32.mrb[8].mxu0 }
 0x6f3   :  { %v620_v27 = vadd.f32 %v1510_v26, %v1992_v53  ;;  %v614_v28 = vpop.f32.mrb[9].mxu0 }
 0x6f4   :  { %v615_v30 = vadd.f32 %v614_v28, %v1990_v52 }
 0x6f5   :  { %v624_v31 = vmax.f32 %v620_v27, 0.0 }
 0x6f6   :  { %v623_v34 = vmax.f32 %v615_v30, 0.0 }
 0x6f7   :  { %v628_v37 = vadd.f32 %v626_v33, %v624_v31 }
 0x6f8   :  { %v627_v38 = vadd.f32 %v625_v36, %v623_v34 }
 0x6f9   :  { %v707_v47 = vmul.f32 0.9, %v628_v37 }
 0x6fa   :  { %v1675_v39 = vpack.c.bf16 %v628_v37, %v627_v38  ;;  %v706_v54 = vmul.f32 0.9, %v627_v38 }
 0x6fc   :  { %1676 = vmatprep.subr.bf16.mxu0 %v1675_v39 }
 0x6fd   :  { %1678 = vmatpush3.bf16.msra.mxu0 %v1675_v39 }
 0x700   :  { %1516 = vmatmul.mubr.msk.f32.vlgmr.msra.gmra.mrb[10].mxu0 %vm298_vm0, %v1984_v51 }
 0x701   :  { %1522 = vmatprep.mubr.msk.f32.mxu0 %vm298_vm0, %v1973_v32 }
 0x7d3   :  { %v1517_v40 = vpop.f32.mrb[10].mxu0 }
 0x7d4   :  { %v701_v42 = vadd.f32 %v1517_v40, %v1992_v53  ;;  %v695_v43 = vpop.f32.mrb[11].mxu0 }
 0x7d5   :  { %v696_v44 = vadd.f32 %v695_v43, %v1990_v52 }
 0x7d6   :  { %v705_v46 = vmax.f32 %v701_v42, 0.0 }
 0x7d7   :  { %v704_v49 = vmax.f32 %v696_v44, 0.0  ;;  %v1780_v44 = vmov 0.0|0.0  }
 0x7d8   :  { %v709_v55 = vadd.f32 %v707_v47, %v705_v46  ;;  %v1782_v46 = vmov 0.0  }
 0x7d9   :  { %v708_v56 = vadd.f32 %v706_v54, %v704_v49 }
 0x7da   :  { %v788_v63 = vmul.f32 0.9, %v709_v55 }
 0x7db   :  { %v1679_v57 = vpack.c.bf16 %v709_v55, %v708_v56  ;;  %v787_v1 = vmul.f32 0.9, %v708_v56 }
 0x7dd   :  { %1680 = vmatprep.subr.bf16.mxu0 %v1679_v57 }
 0x7de   :  { %1682 = vmatpush3.bf16.msra.mxu0 %v1679_v57 }
 0x7e1   :  { %1523 = vmatmul.mubr.msk.f32.vlgmr.msra.gmra.mrb[12].mxu0 %vm298_vm0, %v1984_v51 }
 0x7e2   :  { %1529 = vmatprep.mubr.msk.f32.mxu0 %vm298_vm0, %v1973_v32 }
 0x8b4   :  { %v1524_v58 = vpop.f32.mrb[12].mxu0 }
 0x8b5   :  { %v782_v59 = vadd.f32 %v1524_v58, %v1992_v53  ;;  %v776_v60 = vpop.f32.mrb[13].mxu0 }
 0x8b6   :  { %v777_v61 = vadd.f32 %v776_v60, %v1990_v52 }
 0x8b7   :  { %v786_v62 = vmax.f32 %v782_v59, 0.0 }
 0x8b8   :  { %v785_v0 = vmax.f32 %v777_v61, 0.0 }
 0x8b9   :  { %v790_v2 = vadd.f32 %v788_v63, %v786_v62 }
 0x8ba   :  { %v789_v3 = vadd.f32 %v787_v1, %v785_v0 }
 0x8bb   :  { %v869_v10 = vmul.f32 0.9, %v790_v2 }
 0x8bc   :  { %v1683_v4 = vpack.c.bf16 %v790_v2, %v789_v3  ;;  %v868_v12 = vmul.f32 0.9, %v789_v3 }
 0x8be   :  { %1684 = vmatprep.subr.bf16.mxu0 %v1683_v4 }
 0x8bf   :  { %1686 = vmatpush3.bf16.msra.mxu0 %v1683_v4 }
 0x8c2   :  { %1530 = vmatmul.mubr.msk.f32.vlgmr.msra.gmra.mrb[14].mxu0 %vm298_vm0, %v1984_v51 }
 0x8c3   :  { %1543 = vmatprep.mubr.msk.f32.mxu0 %vm298_vm0, %v1973_v32 }
 0x995   :  { %v1531_v5 = vpop.f32.mrb[14].mxu0 }
 0x996   :  { %v863_v6 = vadd.f32 %v1531_v5, %v1992_v53  ;;  %v857_v7 = vpop.f32.mrb[15].mxu0 }
 0x997   :  { %v858_v8 = vadd.f32 %v857_v7, %v1990_v52 }
 0x998   :  { %v867_v9 = vmax.f32 %v863_v6, 0.0 }
 0x999   :  { %v866_v11 = vmax.f32 %v858_v8, 0.0 }
 0x99a   :  { %v871_v13 = vadd.f32 %v869_v10, %v867_v9 }
 0x99b   :  { %v870_v14 = vadd.f32 %v868_v12, %v866_v11 }
 0x99c   :  { %v950_v24 = vmul.f32 0.9, %v871_v13 }
 0x99d   :  { %v1687_v16 = vpack.c.bf16 %v871_v13, %v870_v14  ;;  %v949_v26 = vmul.f32 0.9, %v870_v14 }
 0x99f   :  { %1688 = vmatprep.subr.bf16.mxu1 %v1687_v16 }
 0x9a0   :  { %1690 = vmatpush3.bf16.msra.mxu1 %v1687_v16 }
 0x9a3   :  { %1537 = vmatmul.mubr.msk.f32.vlgmr.msra.gmra.mrb[2].mxu1 %vm298_vm0, %v1984_v51 }
 0x9a4   :  { %1550 = vmatprep.mubr.msk.f32.mxu1 %vm298_vm0, %v1973_v32 }
 0xa76   :  { %v1538_v18 = vpop.f32.mrb[2].mxu1 }
 0xa77   :  { %v944_v19 = vadd.f32 %v1538_v18, %v1992_v53  ;;  %v938_v20 = vpop.f32.mrb[3].mxu1 }
 0xa78   :  { %v939_v21 = vadd.f32 %v938_v20, %v1990_v52 }
 0xa79   :  { %v948_v22 = vmax.f32 %v944_v19, 0.0 }
 0xa7a   :  { %v947_v25 = vmax.f32 %v939_v21, 0.0 }
 0xa7b   :  { %v952_v27 = vadd.f32 %v950_v24, %v948_v22 }
 0xa7c   :  { %v951_v28 = vadd.f32 %v949_v26, %v947_v25 }
 0xa7d   :  { %v1031_v37 = vmul.f32 0.9, %v952_v27 }
 0xa7e   :  { %v1691_v30 = vpack.c.bf16 %v952_v27, %v951_v28  ;;  %v1030_v39 = vmul.f32 0.9, %v951_v28 }
 0xa80   :  { %1692 = vmatprep.subr.bf16.mxu0 %v1691_v30 }
 0xa81   :  { %1694 = vmatpush3.bf16.msra.mxu0 %v1691_v30 }
 0xa82   :  { %1699 = vmatprep.subr.bf16.mxu0 %v1780_v44 }
 0xa84   :  { %1544 = vmatmul.mubr.msk.f32.vlgmr.msra.gmra.mrb[16].mxu0 %vm298_vm0, %v1984_v51 }
 0xa85   :  { %1557 = vmatprep.mubr.msk.f32.mxu0 %vm1781_vm1, %v1782_v46 }
 0xb57   :  { %v1545_v31 = vpop.f32.mrb[16].mxu0 }
 0xb58   :  { %v1025_v32 = vadd.f32 %v1545_v31, %v1992_v53  ;;  %v1019_v33 = vpop.f32.mrb[17].mxu0 }
 0xb59   :  { %v1020_v34 = vadd.f32 %v1019_v33, %v1990_v52 }
 0xb5a   :  { %v1029_v36 = vmax.f32 %v1025_v32, 0.0 }
 0xb5b   :  { %v1028_v38 = vmax.f32 %v1020_v34, 0.0 }
 0xb5c   :  { %v1033_v40 = vadd.f32 %v1031_v37, %v1029_v36 }
 0xb5d   :  { %v1032_v42 = vadd.f32 %v1030_v39, %v1028_v38 }
 0xb5f   :  { %v1695_v43 = vpack.c.bf16 %v1033_v40, %v1032_v42  ;;  %v1111_v54 = vmul.f32 0.9, %v1032_v42 }
 0xb61   :  { %1696 = vmatprep.subr.bf16.mxu1 %v1695_v43 }
 0xb62   :  { %1698 = vmatpush3.bf16.msra.mxu1 %v1695_v43 }
 0xb63   :  { %1702 = vmatprep.subr.bf16.mxu1 %v1780_v44 }
 0xb65   :  { %1551 = vmatmul.mubr.msk.f32.vlgmr.msra.gmra.mrb[4].mxu1 %vm298_vm0, %v1984_v51 }
 0xb66   :  { %1704 = vmatpush3.bf16.msra.mxu1 %v1856_v15  ;;  %1592 = vmatprep.mubr.msk.f32.mxu1 %vm1781_vm1, %v1782_v46 }
 0xb67   :  { %1705 = vmatprep.subr.bf16.mxu1 %v1780_v44 }
 0xb6a   :  { %1707 = vmatpush3.bf16.msra.mxu1 %v1861_v17 }
 0xb6b   :  { %1708 = vmatprep.subr.bf16.mxu1 %v1780_v44 }
 0xb6e   :  { %1710 = vmatpush3.bf16.msra.mxu1 %v1878_v23 }
 0xb6f   :  { %1711 = vmatprep.subr.bf16.mxu1 %v1780_v44 }
 0xb72   :  { %1713 = vmatpush3.bf16.msra.mxu1 %v1894_v29  ;;  %v1112_v29 = vmul.f32 0.9, %v1033_v40 }
 0xb73   :  { %1714 = vmatprep.subr.bf16.mxu1 %v1780_v44 }
 0xb76   :  { %1716 = vmatpush3.bf16.msra.mxu1 %v1910_v35 }
 0xb77   :  { %1717 = vmatprep.subr.bf16.mxu1 %v1780_v44 }
 0xb7a   :  { %1719 = vmatpush3.bf16.msra.mxu1 %v1926_v41  ;;  %v1115_v41 = vld [vmem:[%s2075_s4] sm:$0xff]  ;;  %s1784_s4 = smov [#allocation2]  }
 0xb7b   :  { %1720 = vmatprep.subr.bf16.mxu1 %v1780_v44  ;;  %s1288_s23 = sshll.u32 %s1784_s4, 4  ;;  %s1289_s23 = int_to_ptr.vmem [resolvable:$true] %s1288_s23 }
 0xb7c   :  { %s1751_s24 = scalar_lea.vmem %s1289_s23, 128  ;;  %p1756_p1 = scmp.lt.s32.totalorder %s1289_s23, %s1289_s23 }
 0xb7d   :  { %p1752_p0 = scmp.ne.s32.totalorder %s1289_s23, %s1751_s24  ;;  %p1757_p2 = scmp.lt.s32.totalorder %s1751_s24, %s1751_s24 }
 0xb7e   :  { %1722 = vmatpush3.bf16.msra.mxu1 %v1936_v45  ;;  %v1783_v45 = vmov 4  }
 0xb7f   :  { %1723 = vmatprep.subr.bf16.mxu1 %v1780_v44  ;;  %1741 = vset.pattern.permute.xlu1 %v1783_v45  ;;  %p1758_p3 = por %p1757_p2, %p1756_p1 }
 0xb80   :  { %1742 = vset.pattern.permute.xlu0 %v1783_v45  ;;  %1190 = vperm.xlu1 %1741, %v1957_v50  }
 0xb81   :  { %p1759_p4 = pnand %p1758_p3, %p1752_p0 }
 0xb82   :  { %1725 = vmatpush3.bf16.msra.mxu1 %v1946_v48 }
 0xc38   :  { %v1552_v15 = vpop.f32.mrb[4].mxu1 }
 0xc39   :  { %v1106_v17 = vadd.f32 %v1552_v15, %v1992_v53  ;;  %v1100_v51 = vpop.f32.mrb[5].mxu1  ;;  %v1191_v53 = vpop.permute.xlu1 %1190 }
 0xc3a   :  { %v1101_v23 = vadd.f32 %v1100_v51, %v1990_v52 }
 0xc3b   :  { %v1110_v47 = vmax.f32 %v1106_v17, 0.0 }
 0xc3c   :  { %v1109_v49 = vmax.f32 %v1101_v23, 0.0 }
 0xc3d   :  { %v1114_v35 = vadd.f32 %v1112_v29, %v1110_v47 }
 0xc3e   :  { %v1113_v55 = vadd.f32 %v1111_v54, %v1109_v49 }
 0xc40   :  { %v1700_v56 = vpack.c.bf16 %v1114_v35, %v1113_v55 }
 0xc42   :  { %1701 = vmatpush3.bf16.msra.mxu0 %v1700_v56 }
 0xc45   :  { %1558 = vmatmul.mubr.msk.f32.vlgmr.msra.gmra.mrb[18].mxu0 %vm298_vm0, %v1115_v41 }
 0xd18   :  { %v1185_v48 = vpop.f32.mrb[18].mxu0 }
 0xd19   :  { %v1559_v52 = vpop.f32.mrb[19].mxu0  ;;  %1593 = vmatmul.mubr.f32.vlgmr.msra.gmra.mrb[6].mxu1 %v1185_v48 }
 0xdec   :  { %v1259_v57 = vpop.f32.mrb[6].mxu1 }
 0xded   :  { %v1260_v58 = vadd.f32 %v1259_v57, %v1191_v53  ;;  %v1594_v59 = vpop.f32.mrb[7].mxu1 }
 0xdef   :  { %v1263_v60 = vrot.slane %v1260_v58, 4 }
 0xdf1   :  { %v1264_v61 = vmax.f32 %v1260_v58, %v1263_v60 }
 0xdf3   :  { %v1265_v62 = vrot.slane %v1264_v61, 2 }
 0xdf5   :  { %v1266_v63 = vmax.f32 %v1264_v61, %v1265_v62 }
 0xdf7   :  { %v1267_v0 = vrot.slane %v1266_v63, 1 }
 0xdf9   :  { %v1268_v1 = vmax.f32 %v1266_v63, %v1267_v0 }
 0xdfb   :  { %v1269_v2 = vsub.f32 %v1260_v58, %v1268_v1 }
 0xdfd   :  { %v1270_v3 = vmul.f32 1.442695, %v1269_v2 }
 0xdff   :  { %1747 = vpow2.f32 %v1270_v3 }
 0xe09   :  { %v1748_v4 = vpop.eup %1747 }
 0xe0a   :  { %v1272_v5 = vrot.slane %v1748_v4, 4 }
 0xe0c   :  { %v1273_v6 = vadd.f32 %v1748_v4, %v1272_v5 }
 0xe0e   :  { %v1274_v50 = vrot.slane %v1273_v6, 2 }
 0xe10   :  { %v1275_v7 = vadd.f32 %v1274_v50, %v1273_v6 }
 0xe12   :  { %v1276_v8 = vrot.slane %v1275_v7, 1 }
 0xe14   :  { %v1277_v9 = vadd.f32 %v1276_v8, %v1275_v7 }
 0xe16   :  { %1749 = vlog2.f32 %v1277_v9 }
 0xe20   :  { %v1750_v10 = vpop.eup %1749 }
 0xe21   :  { %v1279_v11 = vmul.f32 0.6931472, %v1750_v10 }
 0xe23   :  { %v1280_v12 = vsub.f32 %v1269_v2, %v1279_v11 }
 0xe25   :  { %1281 = vst [vmem:[#allocation2] sm:$0xff] %v1280_v12 }
 0xe26   :  { %1762 = shalt.err (!%p1759_p4)
}
 0xe27   :  { %s1763_s27 = scalar_lea.hbm %s2077_s6, 128 }
 0xe28   :  { %p1764_p5 = scmp.ne.s32.totalorder %s2077_s6, %s1763_s27  ;;  %p1767_p6 = scmp.lt.u32.totalorder %s1763_s27, %s2077_s6 }
 0xe2a   :  { %p1769_p7 = pnand %p1767_p6, %p1764_p5 }
 0xe2c   :  { %1772 = shalt.err (!%p1769_p7)
}
 0xe2d   :  { %1291 = dma.vmem_to_hbm [thread:$0]  %s1289_s23, 128, %s2077_s6, [#allocation3]  }
 0xe2e   :  { %1773 = dma.done.wait [#allocation3], 128  }
 0xe2f   :  { %1774 = vsyncadd [#allocation3], 4294967168 }
 0xe30   :  { %1295 = vsyncpa [#allocation3], 1 }

</bundles_post_ra>
